<compile_context>
chip_gen: v5e
topology: v5e:2x2
jax: 0.10.0
libtpu: 0.0.40
codegen_flags: <defaults>
</compile_context>

<pallas_src>
import functools

import jax
import jax.numpy as jnp
from jax.experimental import pallas as pl
from jax.experimental.pallas import tpu as pltpu

_VMEM_LIMIT = 32 * 1024 * 1024  # safe on v5e/v6e/v7x; our tiles use far less


def _rup(x, m):
    return ((x + m - 1) // m) * m


def _largest_div(dp, pref, step):
    """Largest multiple of `step` that is <= pref and divides dp (dp % step == 0)."""
    t = (pref // step) * step
    while dp % t:
        t -= step
    return t


# ----------------------------------------------------------------------------
# Pallas tiled matmul (the conv / fc hot path) -- bf16 operands, f32 accumulate
# ----------------------------------------------------------------------------
def _matmul_kernel(a_ref, b_ref, o_ref, acc_ref):
    @pl.when(pl.program_id(2) == 0)
    def _():
        acc_ref[...] = jnp.zeros_like(acc_ref)

    acc_ref[...] += jnp.dot(a_ref[...], b_ref[...],
                            preferred_element_type=jnp.float32)

    @pl.when(pl.program_id(2) == pl.num_programs(2) - 1)
    def _():
        o_ref[...] = acc_ref[...].astype(o_ref.dtype)


def _plan_dim(dim, pref, sublane):
    """Pick (tile, padded_dim) for one matmul dimension.

    Lane dims are padded to multiples of 128; the sublane (M) dim only needs
    16-alignment (bf16 packing) when it fits in a single tile.  Tiles are
    either the full padded dim or a multiple of 128 that divides it, so no
    partial blocks ever reach the MXU.
    """
    if sublane and dim <= pref:
        dp = _rup(dim, 16)
        return dp, dp
    dp = _rup(dim, 128)
    if dp <= pref:
        return dp, dp
    return _largest_div(dp, pref, 128), dp


def pallas_matmul(a, b, out_dtype=jnp.float32,
                  tm_pref=256, tn_pref=512, tk_pref=512):
    """a: (M, K), b: (K, N) -> (M, N) out_dtype, via bf16 MXU tiles."""
    M, K = a.shape
    K2, N = b.shape
    assert K == K2
    a = a.astype(jnp.bfloat16)
    b = b.astype(jnp.bfloat16)

    tm, Mp = _plan_dim(M, tm_pref, sublane=True)
    tk, Kp = _plan_dim(K, tk_pref, sublane=False)
    tn, Np = _plan_dim(N, tn_pref, sublane=False)

    # Pad only when the real shape is not tile-aligned (no-op for most layers).
    if (Mp, Kp) != (M, K):
        a = jnp.pad(a, ((0, Mp - M), (0, Kp - K)))
    if (Kp, Np) != (K, N):
        b = jnp.pad(b, ((0, Kp - K), (0, Np - N)))

    out = pl.pallas_call(
        _matmul_kernel,
        out_shape=jax.ShapeDtypeStruct((Mp, Np), out_dtype),
        grid_spec=pltpu.PrefetchScalarGridSpec(
            num_scalar_prefetch=0,
            grid=(Mp // tm, Np // tn, Kp // tk),
            in_specs=[pl.BlockSpec((tm, tk), lambda i, j, k: (i, k)),
                      pl.BlockSpec((tk, tn), lambda i, j, k: (k, j))],
            out_specs=pl.BlockSpec((tm, tn), lambda i, j, k: (i, j)),
            scratch_shapes=[pltpu.VMEM((tm, tn), jnp.float32)]),
        compiler_params=pltpu.CompilerParams(
            dimension_semantics=("parallel", "parallel", "arbitrary"),
            vmem_limit_bytes=_VMEM_LIMIT),
    )(a, b)
    if (Mp, Np) != (M, N):
        out = out[:M, :N]
    return out


# ----------------------------------------------------------------------------
# Tiled, pipelined BatchNorm (batch stats) + [residual add] + [ReLU]
#   pass 1: per-channel sum / sumsq reduction over an "arbitrary" M-grid axis
#   pass 2: normalize + scale + shift (+ residual) (+ relu), bf16 output
# ----------------------------------------------------------------------------
def _bn_stats_kernel(x_ref, sum_ref, sq_ref, *, m_true, tm):
    i = pl.program_id(0)

    @pl.when(i == 0)
    def _():
        sum_ref[...] = jnp.zeros_like(sum_ref)
        sq_ref[...] = jnp.zeros_like(sq_ref)

    x = x_ref[...].astype(jnp.float32)
    if m_true % tm != 0:  # mask rows of the (only possible) partial final block
        row = i * tm + jax.lax.broadcasted_iota(jnp.int32, x.shape, 0)
        x = jnp.where(row < m_true, x, 0.0)
    sum_ref[...] += jnp.sum(x, axis=0, keepdims=True)
    sq_ref[...] += jnp.sum(x * x, axis=0, keepdims=True)


def _bn_apply_kernel(x_ref, scale_ref, shift_ref, o_ref, *, relu):
    y = x_ref[...].astype(jnp.float32) * scale_ref[...] + shift_ref[...]
    if relu:
        y = jnp.maximum(y, 0.0)
    o_ref[...] = y.astype(o_ref.dtype)


def _bn_apply_res_kernel(x_ref, r_ref, scale_ref, shift_ref, o_ref):
    y = x_ref[...].astype(jnp.float32) * scale_ref[...] + shift_ref[...]
    y = y + r_ref[...].astype(jnp.float32)
    o_ref[...] = jnp.maximum(y, 0.0).astype(o_ref.dtype)


def pallas_bn_act(x2d, gamma, beta, relu=True, residual=None, eps=1e-5,
                  out_dtype=jnp.bfloat16, tm_pref=256):
    """x2d: (M, C) conv output (f32). Returns bf16 (M, C) normalized activation."""
    M, C = x2d.shape
    x2d = x2d.astype(jnp.float32)
    tm = min(tm_pref, M if M % 8 == 0 else _rup(M, 8))
    grid_m = pl.cdiv(M, tm)

    # -- pass 1: per-channel sum / sumsq ------------------------------------
    stats_kern = functools.partial(_bn_stats_kernel, m_true=M, tm=tm)
    ssum, ssq = pl.pallas_call(
        stats_kern,
        out_shape=(jax.ShapeDtypeStruct((1, C), jnp.float32),
                   jax.ShapeDtypeStruct((1, C), jnp.float32)),
        grid=(grid_m,),
        in_specs=[pl.BlockSpec((tm, C), lambda i: (i, 0))],
        out_specs=(pl.BlockSpec((1, C), lambda i: (0, 0)),
                   pl.BlockSpec((1, C), lambda i: (0, 0))),
        compiler_params=pltpu.CompilerParams(
            dimension_semantics=("arbitrary",),
            vmem_limit_bytes=_VMEM_LIMIT),
    )(x2d)

    # tiny (1, C) math: fold mean/var/gamma/beta into a scale & shift
    mean = ssum / M
    var = ssq / M - mean * mean           # biased variance (PyTorch train mode)
    inv = jax.lax.rsqrt(var + eps)
    scale = gamma.reshape(1, C).astype(jnp.float32) * inv
    shift = beta.reshape(1, C).astype(jnp.float32) - mean * scale

    # -- pass 2: tiled normalize (+ residual) (+ relu), bf16 output ----------
    if residual is None:
        kern = functools.partial(_bn_apply_kernel, relu=relu)
        ins = (x2d, scale, shift)
        in_specs = [pl.BlockSpec((tm, C), lambda i: (i, 0)),
                    pl.BlockSpec((1, C), lambda i: (0, 0)),
                    pl.BlockSpec((1, C), lambda i: (0, 0))]
    else:
        kern = _bn_apply_res_kernel
        ins = (x2d, residual, scale, shift)
        in_specs = [pl.BlockSpec((tm, C), lambda i: (i, 0)),
                    pl.BlockSpec((tm, C), lambda i: (i, 0)),
                    pl.BlockSpec((1, C), lambda i: (0, 0)),
                    pl.BlockSpec((1, C), lambda i: (0, 0))]

    return pl.pallas_call(
        kern,
        out_shape=jax.ShapeDtypeStruct((M, C), out_dtype),
        grid=(grid_m,),
        in_specs=in_specs,
        out_specs=pl.BlockSpec((tm, C), lambda i: (i, 0)),
        compiler_params=pltpu.CompilerParams(
            dimension_semantics=("parallel",),
            vmem_limit_bytes=_VMEM_LIMIT),
    )(*ins)


# ----------------------------------------------------------------------------
# Glue: patch extraction, maxpool, parameter init, model forward
# ----------------------------------------------------------------------------
def im2col(x, kh, kw, stride, pad):
    """x: (N, H, W, C) bf16 -> (N, Ho, Wo, kh*kw*C) bf16."""
    N, H, W, C = x.shape
    xp = jnp.pad(x, ((0, 0), (pad, pad), (pad, pad), (0, 0)))
    Ho = (H + 2 * pad - kh) // stride + 1
    Wo = (W + 2 * pad - kw) // stride + 1
    cols = []
    for i in range(kh):
        for j in range(kw):
            cols.append(xp[:, i:i + stride * (Ho - 1) + 1:stride,
                           j:j + stride * (Wo - 1) + 1:stride, :])
    # TODO(synk): fold the kh*kw taps into the matmul's K grid axis instead of
    # materializing the expanded buffer; kept as bf16 im2col here.
    return jnp.concatenate(cols, axis=-1), Ho, Wo


def maxpool2d(x, k=3, s=2, p=1):
    # TODO(synk): maxpool (only used in the num_classes==1000 stem) stays in
    # lax.reduce_window rather than a dedicated Pallas kernel.
    return jax.lax.reduce_window(
        x, jnp.array(-jnp.inf, x.dtype), jax.lax.max,
        (1, k, k, 1), (1, s, s, 1),
        [(0, 0), (p, p), (p, p), (0, 0)])


def conv_bn(x, w, bn, stride, pad, relu, residual=None):
    """Conv2d(bias=False) -> BatchNorm2d -> [+residual] -> [ReLU]. NHWC bf16."""
    cout, cin, kh, kw = w.shape
    N = x.shape[0]
    x = x.astype(jnp.bfloat16)
    if kh == 1 and kw == 1 and pad == 0:
        xs = x if stride == 1 else x[:, ::stride, ::stride, :]
        Ho, Wo = xs.shape[1], xs.shape[2]
        a = xs.reshape(N * Ho * Wo, cin)            # no im2col for 1x1 convs
    else:
        cols, Ho, Wo = im2col(x, kh, kw, stride, pad)
        a = cols.reshape(N * Ho * Wo, kh * kw * cin)
    wm = (jnp.transpose(w, (2, 3, 1, 0))
             .reshape(kh * kw * cin, cout)
             .astype(jnp.bfloat16))
    y = pallas_matmul(a, wm)                        # (M, cout) f32
    y = pallas_bn_act(y, bn['gamma'], bn['beta'], relu=relu, residual=residual)
    return y.reshape(N, Ho, Wo, cout)               # bf16


def bottleneck(x, p):
    out = conv_bn(x, p['conv1'], p['bn1'], 1, 0, True)
    out = conv_bn(out, p['conv2'], p['bn2'], p['stride'], 1, True)
    if 'ds_w' in p:
        idn = conv_bn(x, p['ds_w'], p['ds_bn'], p['stride'], 0, False)
    else:
        idn = x
    N, H, W, C = idn.shape
    return conv_bn(out, p['conv3'], p['bn3'], 1, 0, True,
                   residual=idn.reshape(N * H * W, C))


EXPANSION = 4


def init_resnet_params(key, layers, num_classes):
    keys = iter(jax.random.split(key, 256))

    def conv_w(cout, cin, kh, kw):
        fan_out = cout * kh * kw
        std = (2.0 / fan_out) ** 0.5
        return std * jax.random.normal(next(keys), (cout, cin, kh, kw), jnp.float32)

    def bn_p(c):
        return {'gamma': jnp.ones((c,), jnp.float32),
                'beta': jnp.zeros((c,), jnp.float32)}

    params = {}
    if num_classes == 1000:
        params['stem'] = {'w': conv_w(64, 3, 7, 7), 'bn': bn_p(64),
                          'stride': 2, 'pad': 3, 'maxpool': True}
    else:
        params['stem'] = {'w': conv_w(64, 3, 3, 3), 'bn': bn_p(64),
                          'stride': 1, 'pad': 1, 'maxpool': False}

    in_ch = 64
    stages = []
    for hid, n, stride in zip((64, 128, 256, 512), layers, (1, 2, 2, 2)):
        blocks = []
        for bi in range(n):
            s = stride if bi == 0 else 1
            blk = {'conv1': conv_w(hid, in_ch, 1, 1), 'bn1': bn_p(hid),
                   'conv2': conv_w(hid, hid, 3, 3), 'bn2': bn_p(hid),
                   'conv3': conv_w(hid * EXPANSION, hid, 1, 1),
                   'bn3': bn_p(hid * EXPANSION),
                   'stride': s}
            if s != 1 or in_ch != hid * EXPANSION:
                blk['ds_w'] = conv_w(hid * EXPANSION, in_ch, 1, 1)
                blk['ds_bn'] = bn_p(hid * EXPANSION)
            blocks.append(blk)
            in_ch = hid * EXPANSION
        stages.append(blocks)
    params['stages'] = stages

    fc_in = 512 * EXPANSION
    params['fc_w'] = ((2.0 / fc_in) ** 0.5) * jax.random.normal(
        next(keys), (fc_in, num_classes), jnp.float32)
    params['fc_b'] = jnp.zeros((num_classes,), jnp.float32)
    return params


def resnet_forward(params, x_nchw):
    x = jnp.transpose(x_nchw, (0, 2, 3, 1)).astype(jnp.bfloat16)   # NCHW -> NHWC
    st = params['stem']
    x = conv_bn(x, st['w'], st['bn'], st['stride'], st['pad'], True)
    if st['maxpool']:
        x = maxpool2d(x)
    for blocks in params['stages']:
        for blk in blocks:
            x = bottleneck(x, blk)
    feat = jnp.mean(x.astype(jnp.float32), axis=(1, 2))    # AdaptiveAvgPool2d((1,1)) + flatten
    logits = pallas_matmul(feat, params['fc_w']) + params['fc_b']
    return logits


if __name__ == "__main__":
    key = jax.random.PRNGKey(0)
    k_params, k_x = jax.random.split(key)

    num_classes = 10            # != 1000 -> 3x3/stride-1 stem (no maxpool), as in the module
    layers = (1, 1, 1, 1)       # small synthetic depth
    params = init_resnet_params(k_params, layers, num_classes)

    x = jax.random.normal(k_x, (2, 3, 16, 16), jnp.float32)   # NCHW, PyTorch convention
    y = resnet_forward(params, x)
    y = jax.block_until_ready(y)
    assert y.shape == (2, num_classes)
    assert bool(jnp.all(jnp.isfinite(y)))
    print("KERNEL_OK")
</pallas_src>

<mosaic_0001>
module attributes {stable_mosaic.version = 11 : i64} {
  func.func @_matmul_kernel(%arg0: i32, %arg1: i32, %arg2: i32, %arg3: memref<256x128xbf16, #tpu.memory_space<vmem>>, %arg4: memref<128x128xbf16, #tpu.memory_space<vmem>>, %arg5: memref<256x128xf32, #tpu.memory_space<vmem>>, %arg6: memref<256x128xf32, #tpu.memory_space<vmem>>) attributes {dimension_semantics = [#tpu.dimension_semantics<parallel>, #tpu.dimension_semantics<parallel>, #tpu.dimension_semantics<arbitrary>], iteration_bounds = array<i64: 2, 1, 1>, scalar_prefetch = 0 : i64, scratch_operands = 1 : i64, tpu.core_type = #tpu.core_type<tc>, window_params = [{transform_indices = @transform_0, window_bounds = array<i64: 256, 128>}, {transform_indices = @transform_1, window_bounds = array<i64: 128, 128>}, {transform_indices = @transform_2, window_bounds = array<i64: 256, 128>}]} {
    %c0_i32 = arith.constant 0 : i32
    %0 = arith.cmpi eq, %arg2, %c0_i32 : i32
    %1 = arith.extui %0 : i1 to i32
    %c0_i32_0 = arith.constant 0 : i32
    %2 = arith.cmpi ne, %1, %c0_i32_0 : i32
    scf.if %2 {
      %cst_10 = arith.constant 0.000000e+00 : f32
      %12 = vector.broadcast %cst_10 : f32 to vector<256x128xf32>
      %c0_11 = arith.constant 0 : index
      %c0_12 = arith.constant 0 : index
      %13 = vector.load %arg6[%c0_11, %c0_12] : memref<256x128xf32, #tpu.memory_space<vmem>>, vector<256x128xf32>
      tpu.vector_store %arg6[%c0_11, %c0_12], %12 {strides = array<i32>} : memref<256x128xf32, #tpu.memory_space<vmem>>, vector<256x128xf32>,
    } else {
    }
    %c0 = arith.constant 0 : index
    %c0_1 = arith.constant 0 : index
    %3 = vector.load %arg6[%c0, %c0_1] : memref<256x128xf32, #tpu.memory_space<vmem>>, vector<256x128xf32>
    %c0_2 = arith.constant 0 : index
    %c0_3 = arith.constant 0 : index
    %4 = vector.load %arg3[%c0_2, %c0_3] : memref<256x128xbf16, #tpu.memory_space<vmem>>, vector<256x128xbf16>
    %c0_4 = arith.constant 0 : index
    %c0_5 = arith.constant 0 : index
    %5 = vector.load %arg4[%c0_4, %c0_5] : memref<128x128xbf16, #tpu.memory_space<vmem>>, vector<128x128xbf16>
    %cst = arith.constant dense<0.000000e+00> : vector<256x128xf32>
    %6 = tpu.matmul %4, %5, %cst {dimension_numbers = #tpu.dot_dimension_numbers<[1], [0], [0], [1], [0, 0, 1, 1], [], []>} : vector<256x128xbf16>, vector<128x128xbf16>, vector<256x128xf32> -> vector<256x128xf32>
    %7 = arith.addf %3, %6 : vector<256x128xf32>
    %c0_6 = arith.constant 0 : index
    %c0_7 = arith.constant 0 : index
    %8 = vector.load %arg6[%c0_6, %c0_7] : memref<256x128xf32, #tpu.memory_space<vmem>>, vector<256x128xf32>
    tpu.vector_store %arg6[%c0_6, %c0_7], %7 {strides = array<i32>} : memref<256x128xf32, #tpu.memory_space<vmem>>, vector<256x128xf32>,
    %c0_i32_8 = arith.constant 0 : i32
    %9 = arith.cmpi eq, %arg2, %c0_i32_8 : i32
    %10 = arith.extui %9 : i1 to i32
    %c0_i32_9 = arith.constant 0 : i32
    %11 = arith.cmpi ne, %10, %c0_i32_9 : i32
    scf.if %11 {
      %c0_10 = arith.constant 0 : index
      %c0_11 = arith.constant 0 : index
      %12 = vector.load %arg6[%c0_10, %c0_11] : memref<256x128xf32, #tpu.memory_space<vmem>>, vector<256x128xf32>
      %c0_12 = arith.constant 0 : index
      %c0_13 = arith.constant 0 : index
      %13 = vector.load %arg5[%c0_12, %c0_13] : memref<256x128xf32, #tpu.memory_space<vmem>>, vector<256x128xf32>
      tpu.vector_store %arg5[%c0_12, %c0_13], %12 {strides = array<i32>} : memref<256x128xf32, #tpu.memory_space<vmem>>, vector<256x128xf32>,
    } else {
    }
    return
  }
  func.func @transform_0(%arg0: i32, %arg1: i32, %arg2: i32) -> (i32, i32) {
    %c0_i32 = arith.constant 0 : i32
    return %arg0, %arg2 : i32, i32
  }
  func.func @transform_1(%arg0: i32, %arg1: i32, %arg2: i32) -> (i32, i32) {
    %c0_i32 = arith.constant 0 : i32
    return %arg2, %arg1 : i32, i32
  }
  func.func @transform_2(%arg0: i32, %arg1: i32, %arg2: i32) -> (i32, i32) {
    %c0_i32 = arith.constant 0 : i32
    return %arg0, %arg1 : i32, i32
  }
}

</mosaic_0001>

<bundles_post_ra>
// kernel: tpu_custom_call.1
= control target key start
LH: loop header
LB: loop body
LE: loop exit
PB: predicated region body
PF: predicated region fallthrough
CT: control target
= control target key end

     0   :  { %7 = vsyncpa [#allocation4], 0  ;;  %s1435_s0 = inlined_call_operand.hbm [shape: bf16[512,128], index: 0, kind: input, shape index: {}]   ;;  %s1436_s1 = inlined_call_operand.hbm [shape: bf16[128,128], index: 1, kind: input, shape index: {}]   ;;  %s1437_s2 = inlined_call_operand.hbm [shape: f32[512,128], index: 2, kind: output, shape index: {}]  }
   0x1   :  { %9 = vsyncpa [#allocation4 + $0x1], 0 }
   0x2   :  { %10 = vsyncpa [#allocation7], 0 }
   0x3   :  { %11 = vsyncpa [#allocation5], 0 }
   0x4   :  { %13 = vsyncpa [#allocation5 + $0x1], 0  ;;  %s1226_s9 = smov 0   ;;  %s1228_s10 = smov 0  }
   0x5   :  { %s1230_s11 = smov 0   ;;  %s1232_s12 = smov 0  }
   0x6   :  { %s1234_s13 = smov 0   ;;  %s1236_s14 = smov 0  }
   0x7 LB: > { %s818_s15 = sadd.s32 4294967295, %s1204_s14   ;;  %s819_s16 = sadd.s32 4294967294, %s1204_s14   ;;  %s1204_s14 = sphi %s1236_s14, %s19_s14   ;;  %s1200_s13 = sphi %s1234_s13, %s1449_s13   ;;  %s1196_s12 = sphi %s1232_s12, %s1448_s12   ;;  %s1192_s11 = sphi %s1230_s11, %s1447_s11   ;;  %s1188_s10 = sphi %s1228_s10, %s1446_s10   ;;  %s1184_s9 = sphi %s1226_s9, %s1445_s9  }
   0x8   : > { %p60_p0 = scmp.ne.s32.totalorder %s1188_s10, %s1184_s9  ;;  %p1260_p1 = scmp.eq.s32.totalorder %s818_s15, 0 }
   0x9   : > { %p1264_p2 = scmp.eq.s32.totalorder %s818_s15, 1  ;;  %p120_p3 = scmp.eq.s32.totalorder %s819_s16, 1 }
   0xa   : > { %p1270_p4 = por %p1260_p1, %p60_p0  ;;  %p820_p5 = scmp.ge.s32.totalorder %s1204_s14, 1 }
   0xb   : > { %p1275_p6 = por %p120_p3, %p60_p0  ;;  %p127_p7 = scmp.lt.s32.totalorder %s1204_s14, 3 }
   0xc   : > { %s142_s23 = sshll.u32 %s1436_s1, 4  ;;  %s1206_s25 = smov [#allocation6]   ;;  %s143_s23 = int_to_ptr.hbm [resolvable:$true] %s142_s23 }
   0xd   : > { %p1283_p8 = pnand %p820_p5, %p127_p7  ;;  %s144_s26 = sshll.u32 %s1206_s25, 4  ;;  %s145_s26 = int_to_ptr.vmem [resolvable:$true] %s144_s26 }
   0xe   : > { %p822_p11 = scmp.ge.s32.totalorder %s1204_s14, 2  ;;  %s1207_s27 = smov 64  }
   0xf   : > { %p989_p9 = pneg %p1283_p8  ;;  %s1208_s28 = smov 4  }
  0x10   : > { %s38_s29 = sadd.s32 1, %s1200_s13  ;;  %s47_s30 = sadd.s32 1, %s1192_s11 }
  0x11   : > { %p990_p10 = pnand %p989_p9, %p1260_p1  ;;  %p40_p12 = scmp.ge.s32.totalorder %s38_s29, 2 }
  0x12   : > { %p54_p13 = scmp.ne.s32.totalorder %s1192_s11, %s1188_s10  ;;  %p55_p0 = scmp.eq.s32.totalorder %s1204_s14, 0 }
  0x13   : > { %992 = dma.hbm_to_vmem [thread:$0]  (!%p990_p10), %s143_s23, 1024, %s145_s26, [#allocation7], %s1207_s27, %s1207_s27, %s1208_s28  }
  0x14   : > { %s1451_s29 = smov (%p40_p12, %s38_s29), 0  ;;  %p1302_p3 = por %p55_p0, %p54_p13 }
  0x15   : > { %p1308_p5 = por %p1264_p2, %p54_p13  ;;  %s42_s5 = ssub.s32 %s1200_s13, %s1451_s29 }
  0x16   : > { %p1002_p7 = scmp.lt.s32.totalorder %s1204_s14, 2  ;;  %p45_p9 = scmp.eq.s32.totalorder %s42_s5, 0 }
  0x17   : > { %s158_s6 = sand.u32 1, %s1192_s11   ;;  %s931_s15 = sshll.u32 %s1200_s13, 7 }
  0x18   : > { %s823_s7 = sshll.u32 %s158_s6, 7  ;;  %s168_s22 = scalar_lea.hbm %s1435_s0, %s931_s15 }
  0x19   : > { %s1317_s8 = scalar_select %p45_p9, %s1192_s11, %s47_s30  }
  0x1a   : > { %s162_s23 = scalar_lea.vmem [#allocation3], %s823_s7  ;;  %s169_s18 = sshll.u32 %s168_s22, 4  ;;  %s170_s18 = int_to_ptr.hbm [resolvable:$true] %s169_s18 }
  0x1b   : > { %s171_s25 = sshll.u32 %s162_s23, 4  ;;  %p994_p2 = pnand %p1002_p7, %p1302_p3  ;;  %s172_s25 = int_to_ptr.vmem [resolvable:$true] %s171_s25 }
  0x1c   : > { %s159_s26 = scalar_lea.sflag [#allocation4], %s158_s6  ;;  %183 = sbr.rel (%p1283_p8) target bundleno = 262 (0x106), region = 28 }
  0x1d   : > { %996 = dma.hbm_to_vmem [thread:$0]  (!%p994_p2), %s170_s18, 2048, %s172_s25, %s159_s26, %s1207_s27, %s1207_s27, %s1208_s28  }
  0x1e   : > { %s1331_s30 = sand.u32 (!%p1283_p8), 1, %s1188_s10  }
  0x1f   : > { %s827_s5 = sshll.u32 (!%p1283_p8), %s1331_s30, 7  ;;  %s186_s7 = scalar_lea.sflag (!%p1283_p8), [#allocation4], %s1331_s30 }
  0x20   : > { %s1335_s15 = scalar_lea.vmem (!%p1283_p8), [#allocation3], %s827_s5 }
  0x21   : > { %1171 = dma.done.wait (%p1270_p4), %s186_s7, 2048  }
  0x22   : > { %1173 = vsyncadd (%p1270_p4), %s186_s7, 4294965248 }
  0x23   : > { %1175 = dma.done.wait (%p1260_p1), [#allocation7], 1024  }
  0x24   : > { %1177 = vsyncadd (%p1260_p1), [#allocation7], 4294966272  ;;  %v955_v0 = vld [vmem:[#allocation6 + $0x38] sm:$0xff]  ;;  %v954_v1 = vld [vmem:[#allocation6 + $0x30] sm:$0xff]  ;;  %s829_s17 = sshll.u32 %s1331_s30, 8  ;;  %s956_s24 = sshll.u32 %s1196_s12, 8 }
  0x25   : > { %479 = vmatpush.bf16.msra.mxu0 %v955_v0  ;;  %957 = vmatpush.bf16.msra.mxu1 %v955_v0  ;;  %v953_v2 = vld [vmem:[#allocation6 + $0x28] sm:$0xff]  ;;  %v952_v3 = vld [vmem:[#allocation6 + $0x20] sm:$0xff]  ;;  %v951_v4 = vld [vmem:[#allocation6 + $0x18] sm:$0xff]  ;;  %s1362_s19 = scalar_lea.vmem [#allocation8], %s829_s17  ;;  %s712_s3 = scalar_lea.hbm %s1437_s2, %s956_s24 }
  0x26   : > { %958 = vmatpush.bf16.msra.mxu2 %v955_v0  ;;  %959 = vmatpush.bf16.msra.mxu3 %v955_v0  ;;  %v950_v5 = vld [vmem:[#allocation6 + $0x10] sm:$0xff]  ;;  %v949_v6 = vld [vmem:[#allocation6 + $0x8] sm:$0xff]  ;;  %v948_v7 = vld [vmem:[#allocation6] sm:$0xff]  ;;  %s713_s6 = sshll.u32 %s1362_s19, 4  ;;  %s715_s16 = sshll.u32 %s712_s3, 4  ;;  %s714_s6 = int_to_ptr.vmem [resolvable:$true] %s713_s6  ;;  %s716_s16 = int_to_ptr.hbm [resolvable:$true] %s715_s16 }
  0x27   : > { %v932_v8 = vld [vmem:[%s1335_s15] sm:$0xff]  ;;  %v933_v12 = vld [vmem:[%s1335_s15 + $0x8] sm:$0xff]  ;;  %v934_v16 = vld [vmem:[%s1335_s15 + $0x10] sm:$0xff]  ;;  %s700_s12 = scalar_lea.sflag [#allocation5], %s1331_s30  ;;  %s1132_s21 = sshra.s32 %s716_s16, 4  ;;  %s1133_s21 = int_to_ptr.hbm [resolvable:$true] %s1132_s21 }
  0x28   : > { %v936_v9 = vld [vmem:[%s1335_s15 + $0x20] sm:$0xff]  ;;  %v937_v13 = vld [vmem:[%s1335_s15 + $0x28] sm:$0xff]  ;;  %v938_v17 = vld [vmem:[%s1335_s15 + $0x30] sm:$0xff]  ;;  %s1134_s22 = scalar_lea.hbm %s1133_s21, 256  ;;  %s1138_s18 = scalar_lea.hbm %s1437_s2, 512 }
  0x29   : > { %480 = vmatpush.bf16.msra.mxu0 %v954_v1  ;;  %960 = vmatpush.bf16.msra.mxu1 %v954_v1  ;;  %v940_v10 = vld [vmem:[%s1335_s15 + $0x40] sm:$0xff]  ;;  %v941_v14 = vld [vmem:[%s1335_s15 + $0x48] sm:$0xff]  ;;  %v942_v18 = vld [vmem:[%s1335_s15 + $0x50] sm:$0xff]  ;;  %p1135_p1 = scmp.ne.s32.totalorder %s1133_s21, %s1134_s22  ;;  %p1139_p10 = scmp.lt.s32.totalorder %s1133_s21, %s1437_s2 }
  0x2a   : > { %961 = vmatpush.bf16.msra.mxu2 %v954_v1  ;;  %962 = vmatpush.bf16.msra.mxu3 %v954_v1  ;;  %v944_v11 = vld [vmem:[%s1335_s15 + $0x60] sm:$0xff]  ;;  %v945_v15 = vld [vmem:[%s1335_s15 + $0x68] sm:$0xff]  ;;  %v946_v19 = vld [vmem:[%s1335_s15 + $0x70] sm:$0xff]  ;;  %p1140_p12 = scmp.lt.s32.totalorder %s1138_s18, %s1134_s22 }
  0x2b   : > { %v935_v20 = vld [vmem:[%s1335_s15 + $0x18] sm:$0xff]  ;;  %p1136_p4 = pnand %p1135_p1, %p1308_p5 }
  0x2c   : > { %v939_v21 = vld [vmem:[%s1335_s15 + $0x38] sm:$0xff]  ;;  %p1141_p13 = por %p1140_p12, %p1139_p10 }
  0x2d   : > { %481 = vmatpush.bf16.msra.mxu0 %v953_v2  ;;  %963 = vmatpush.bf16.msra.mxu1 %v953_v2  ;;  %v943_v22 = vld [vmem:[%s1335_s15 + $0x58] sm:$0xff]  ;;  %p1137_p8 = pneg %p1136_p4 }
  0x2e   : > { %964 = vmatpush.bf16.msra.mxu2 %v953_v2  ;;  %965 = vmatpush.bf16.msra.mxu3 %v953_v2  ;;  %v947_v23 = vld [vmem:[%s1335_s15 + $0x78] sm:$0xff] }
  0x2f   : > { %p1142_p0 = pnand %p1141_p13, %p1137_p8 }
  0x31   : > { %482 = vmatpush.bf16.msra.mxu0 %v952_v3  ;;  %966 = vmatpush.bf16.msra.mxu1 %v952_v3 }
  0x32   : > { %967 = vmatpush.bf16.msra.mxu2 %v952_v3  ;;  %968 = vmatpush.bf16.msra.mxu3 %v952_v3 }
  0x35   : > { %483 = vmatpush.bf16.msra.mxu0 %v951_v4  ;;  %969 = vmatpush.bf16.msra.mxu1 %v951_v4 }
  0x36   : > { %970 = vmatpush.bf16.msra.mxu2 %v951_v4  ;;  %971 = vmatpush.bf16.msra.mxu3 %v951_v4 }
  0x39   : > { %484 = vmatpush.bf16.msra.mxu0 %v950_v5  ;;  %972 = vmatpush.bf16.msra.mxu1 %v950_v5 }
  0x3a   : > { %973 = vmatpush.bf16.msra.mxu2 %v950_v5  ;;  %974 = vmatpush.bf16.msra.mxu3 %v950_v5 }
  0x3d   : > { %485 = vmatpush.bf16.msra.mxu0 %v949_v6  ;;  %975 = vmatpush.bf16.msra.mxu1 %v949_v6 }
  0x3e   : > { %976 = vmatpush.bf16.msra.mxu2 %v949_v6  ;;  %977 = vmatpush.bf16.msra.mxu3 %v949_v6 }
  0x41   : > { %486 = vmatpush.bf16.msra.mxu0 %v948_v7  ;;  %978 = vmatpush.bf16.msra.mxu1 %v948_v7 }
  0x42   : > { %979 = vmatpush.bf16.msra.mxu2 %v948_v7  ;;  %980 = vmatpush.bf16.msra.mxu3 %v948_v7 }
  0x44   : > { %487 = vmatmul.bf16.vlgmr.msra.gmra.mxu0 %v932_v8  ;;  %507 = vmatmul.bf16.vlgmr.msra.gmra.mxu1 %v936_v9 }
  0x45   : > { %527 = vmatmul.bf16.vlgmr.msra.gmra.mxu2 %v940_v10  ;;  %547 = vmatmul.bf16.vlgmr.msra.gmra.mxu3 %v944_v11 }
  0x54   : > { %492 = vmatmul.bf16.gmra.mxu0 %v933_v12  ;;  %512 = vmatmul.bf16.gmra.mxu1 %v937_v13 }
  0x55   : > { %532 = vmatmul.bf16.gmra.mxu2 %v941_v14  ;;  %552 = vmatmul.bf16.gmra.mxu3 %v945_v15 }
  0x64   : > { %497 = vmatmul.bf16.gmra.mxu0 %v934_v16  ;;  %517 = vmatmul.bf16.gmra.mxu1 %v938_v17 }
  0x65   : > { %537 = vmatmul.bf16.gmra.mxu2 %v942_v18  ;;  %557 = vmatmul.bf16.gmra.mxu3 %v946_v19 }
  0x74   : > { %502 = vmatmul.bf16.gmra.mxu0 %v935_v20  ;;  %522 = vmatmul.bf16.gmra.mxu1 %v939_v21 }
  0x75   : > { %542 = vmatmul.bf16.gmra.mxu2 %v943_v22  ;;  %562 = vmatmul.bf16.gmra.mxu3 %v947_v23 }
  0xc1   : > { %v488_v24 = vpop.f32.mrf.mxu0  ;;  %v508_v25 = vpop.f32.mrf.mxu1 }
  0xc2   : > { %667 = vst [vmem:[%s1362_s19] sm:$0xff] %v488_v24 }
  0xc3   : > { %675 = vst [vmem:[%s1362_s19 + $0x40] sm:$0xff] %v508_v25 }
  0xc8   : > { %v528_v26 = vpop.f32.mrf.mxu2  ;;  %v548_v27 = vpop.f32.mrf.mxu3 }
  0xc9   : > { %683 = vst [vmem:[%s1362_s19 + $0x80] sm:$0xff] %v528_v26  ;;  %v490_v28 = vpop.f32.mrf.mxu0  ;;  %v510_v29 = vpop.f32.mrf.mxu1 }
  0xca   : > { %691 = vst [vmem:[%s1362_s19 + $0xc0] sm:$0xff] %v548_v27 }
  0xcb   : > { %668 = vst [vmem:[%s1362_s19 + $0x8] sm:$0xff] %v490_v28 }
  0xcc   : > { %676 = vst [vmem:[%s1362_s19 + $0x48] sm:$0xff] %v510_v29 }
  0xd0   : > { %v530_v30 = vpop.f32.mrf.mxu2  ;;  %v550_v31 = vpop.f32.mrf.mxu3 }
  0xd1   : > { %684 = vst [vmem:[%s1362_s19 + $0x88] sm:$0xff] %v530_v30  ;;  %v493_v32 = vpop.f32.mrf.mxu0  ;;  %v513_v33 = vpop.f32.mrf.mxu1 }
  0xd2   : > { %692 = vst [vmem:[%s1362_s19 + $0xc8] sm:$0xff] %v550_v31 }
  0xd3   : > { %669 = vst [vmem:[%s1362_s19 + $0x10] sm:$0xff] %v493_v32 }
  0xd4   : > { %677 = vst [vmem:[%s1362_s19 + $0x50] sm:$0xff] %v513_v33 }
  0xd8   : > { %v533_v34 = vpop.f32.mrf.mxu2  ;;  %v553_v35 = vpop.f32.mrf.mxu3 }
  0xd9   : > { %685 = vst [vmem:[%s1362_s19 + $0x90] sm:$0xff] %v533_v34  ;;  %v495_v36 = vpop.f32.mrf.mxu0  ;;  %v515_v37 = vpop.f32.mrf.mxu1 }
  0xda   : > { %693 = vst [vmem:[%s1362_s19 + $0xd0] sm:$0xff] %v553_v35 }
  0xdb   : > { %670 = vst [vmem:[%s1362_s19 + $0x18] sm:$0xff] %v495_v36 }
  0xdc   : > { %678 = vst [vmem:[%s1362_s19 + $0x58] sm:$0xff] %v515_v37 }
  0xe0   : > { %v535_v38 = vpop.f32.mrf.mxu2  ;;  %v555_v39 = vpop.f32.mrf.mxu3 }
  0xe1   : > { %686 = vst [vmem:[%s1362_s19 + $0x98] sm:$0xff] %v535_v38  ;;  %v498_v40 = vpop.f32.mrf.mxu0  ;;  %v518_v41 = vpop.f32.mrf.mxu1 }
  0xe2   : > { %694 = vst [vmem:[%s1362_s19 + $0xd8] sm:$0xff] %v555_v39 }
  0xe3   : > { %671 = vst [vmem:[%s1362_s19 + $0x20] sm:$0xff] %v498_v40 }
  0xe4   : > { %679 = vst [vmem:[%s1362_s19 + $0x60] sm:$0xff] %v518_v41 }
  0xe8   : > { %v538_v42 = vpop.f32.mrf.mxu2  ;;  %v558_v43 = vpop.f32.mrf.mxu3 }
  0xe9   : > { %687 = vst [vmem:[%s1362_s19 + $0xa0] sm:$0xff] %v538_v42  ;;  %v500_v44 = vpop.f32.mrf.mxu0  ;;  %v520_v45 = vpop.f32.mrf.mxu1 }
  0xea   : > { %695 = vst [vmem:[%s1362_s19 + $0xe0] sm:$0xff] %v558_v43 }
  0xeb   : > { %672 = vst [vmem:[%s1362_s19 + $0x28] sm:$0xff] %v500_v44 }
  0xec   : > { %680 = vst [vmem:[%s1362_s19 + $0x68] sm:$0xff] %v520_v45 }
  0xf0   : > { %v540_v46 = vpop.f32.mrf.mxu2  ;;  %v560_v47 = vpop.f32.mrf.mxu3 }
  0xf1   : > { %688 = vst [vmem:[%s1362_s19 + $0xa8] sm:$0xff] %v540_v46  ;;  %v503_v48 = vpop.f32.mrf.mxu0  ;;  %v523_v49 = vpop.f32.mrf.mxu1 }
  0xf2   : > { %696 = vst [vmem:[%s1362_s19 + $0xe8] sm:$0xff] %v560_v47 }
  0xf3   : > { %673 = vst [vmem:[%s1362_s19 + $0x30] sm:$0xff] %v503_v48 }
  0xf4   : > { %681 = vst [vmem:[%s1362_s19 + $0x70] sm:$0xff] %v523_v49 }
  0xf8   : > { %v543_v50 = vpop.f32.mrf.mxu2  ;;  %v563_v51 = vpop.f32.mrf.mxu3 }
  0xf9   : > { %689 = vst [vmem:[%s1362_s19 + $0xb0] sm:$0xff] %v543_v50  ;;  %v505_v52 = vpop.f32.mrf.mxu0  ;;  %v525_v53 = vpop.f32.mrf.mxu1 }
  0xfa   : > { %697 = vst [vmem:[%s1362_s19 + $0xf0] sm:$0xff] %v563_v51 }
  0xfb   : > { %674 = vst [vmem:[%s1362_s19 + $0x38] sm:$0xff] %v505_v52 }
  0xfc   : > { %682 = vst [vmem:[%s1362_s19 + $0x78] sm:$0xff] %v525_v53 }
 0x100   : > { %v545_v54 = vpop.f32.mrf.mxu2  ;;  %v565_v55 = vpop.f32.mrf.mxu3 }
 0x101   : > { %690 = vst [vmem:[%s1362_s19 + $0xb8] sm:$0xff] %v545_v54 }
 0x102   : > { %698 = vst [vmem:[%s1362_s19 + $0xf8] sm:$0xff] %v565_v55 }
 0x103   : > { %1145 = shalt.err (!%p1142_p0)
}
 0x104   : > { %s1209_s30 = smov 128   ;;  %s1210_s7 = smov 8  }
 0x105   : > { %987 = dma.vmem_to_hbm [thread:$0]  (%p1308_p5), %s714_s6, 4096, %s716_s16, %s700_s12, %s1209_s30, %s1209_s30, %s1210_s7  }
 0x106 PF: > { %s730_s15 = sand.u32 1, %s1184_s9   ;;  %p998_p3 = pnand %p822_p11, %p1275_p6 }
 0x107   : > { %s731_s17 = scalar_lea.sflag [#allocation5], %s730_s15 }
 0x108   : > { %p999_p7 = pneg %p998_p3 }
 0x10a   : > { %1179 = dma.done.wait (%p999_p7), %s731_s17, 4096  }
 0x10b   : > { %1181 = vsyncadd (%p999_p7), %s731_s17, 4294963200  ;;  %s19_s14 = sadd.s32 1, %s1204_s14   ;;  %s1445_s9 = smov %s1188_s10 }
 0x10c   : > { %p16_p9 = scmp.ge.s32.totalorder %s19_s14, 4   ;;  %s1446_s10 = smov %s1192_s11 }
 0x10d   : > { %s1447_s11 = smov %s1317_s8  ;;  %s1448_s12 = smov %s1200_s13 }
 0x10e   : > { %s1449_s13 = smov %s1451_s29  ;;  %18 = sbr.rel (!%p16_p9) target bundleno = 7 (0x7), region = 86 }
 0x113   :  { %737 = vsyncpa [#allocation4], 1 }
 0x114   :  { %739 = vsyncpa [#allocation4 + $0x1], 1 }
 0x115   :  { %740 = vsyncpa [#allocation7], 1 }
 0x116   :  { %741 = vsyncpa [#allocation5], 1 }
 0x117   :  { %743 = vsyncpa [#allocation5 + $0x1], 1 }

</bundles_post_ra>
